<compile_context>
chip_gen: v7x
topology: tpu7x:2x2x1
jax: 0.10.0
libtpu: 0.0.40
codegen_flags: <defaults>
</compile_context>

<pallas_src>
import jax
import jax.numpy as jnp
from jax.experimental import pallas as pl
from jax.experimental.pallas import tpu as pltpu

LEAKY_SLOPE = 0.01  # nn.LeakyReLU default negative_slope


def _round_up(x: int, m: int) -> int:
    return ((x + m - 1) // m) * m


def _make_decoder_kernel(num_layers: int, normalize: bool):
    """Kernel for one (batch-tile, k-tile) grid point.

    Ref order: x_ref, (w_ref, b_ref) * num_layers, out_ref, acc_ref
      x_ref : (tile_b, tile_k)   bf16   -- K-slice of the flattened input
      w0    : (tile_k, D1p)      bf16   -- K-slice of first-layer weight
      wl>=1 : (Dlp, Dl+1p)       bf16   -- full (small) tail weights
      b*    : (1, D*p)           f32
      out   : (tile_b, DLp)      f32
      acc   : (tile_b, D1p)      f32 VMEM scratch (layer-0 partial sums)
    """

    def kernel(*refs):
        x_ref = refs[0]
        out_ref = refs[1 + 2 * num_layers]
        acc_ref = refs[2 + 2 * num_layers]
        w0_ref = refs[1]
        b0_ref = refs[2]

        k = pl.program_id(1)

        @pl.when(k == 0)
        def _init():
            acc_ref[...] = jnp.zeros_like(acc_ref)

        # Layer 0 partial product: bf16 operands, f32 accumulate on the MXU.
        acc_ref[...] += jnp.dot(
            x_ref[...], w0_ref[...], preferred_element_type=jnp.float32
        )

        @pl.when(k == pl.num_programs(1) - 1)
        def _finalize():
            h = acc_ref[...] + b0_ref[...]  # f32
            for layer in range(1, num_layers):
                w_ref = refs[1 + 2 * layer]
                b_ref = refs[2 + 2 * layer]
                # LeakyReLU in f32 (VPU), Dropout == identity (eval mode)
                h = jnp.where(h >= 0.0, h, LEAKY_SLOPE * h)
                h = (
                    jnp.dot(
                        h.astype(w_ref.dtype),
                        w_ref[...],
                        preferred_element_type=jnp.float32,
                    )
                    + b_ref[...]
                )
            if normalize:
                # per-row L2 norm (matches torch.norm(x, dim=1, keepdim=True));
                # padded columns are exactly zero so they do not perturb the sum.
                ssq = jnp.sum(h * h, axis=1, keepdims=True)
                h = h * jax.lax.rsqrt(ssq)
            out_ref[...] = h.astype(out_ref.dtype)

    return kernel


def decoder_forward(
    x,
    weights,
    biases,
    *,
    normalize=False,
    tile_b=None,
    tile_k=None,
    operand_dtype=jnp.bfloat16,
):
    """Pallas Decoder forward.

    x       : [B, ...]  (flattened to [B, D0] like torch flatten(start_dim=1))
    weights : list of [D_in, D_out] matrices (transposed vs. nn.Linear.weight)
    biases  : list of [D_out] vectors
    """
    B = x.shape[0]
    xf = x.reshape(B, -1)
    D0 = xf.shape[1]
    num_layers = len(weights)
    assert weights[0].shape[0] == D0

    dims = [D0] + [int(w.shape[1]) for w in weights]
    # Lane-dense padding: every feature dim -> multiple of 128.
    dims_p = [_round_up(d, 128) for d in dims]

    # --- K tiling of the first (large) layer ------------------------------
    if tile_k is None:
        tile_k = min(512, dims_p[0])
    tile_k = _round_up(tile_k, 128)
    D0p = _round_up(dims[0], tile_k)
    dims_p[0] = D0p
    nk = D0p // tile_k

    # --- batch tiling ------------------------------------------------------
    if tile_b is None:
        # >=128-row tiles for realistic batches; tiny batches just round to 8.
        tile_b = min(256, _round_up(B, 8))
    tile_b = _round_up(tile_b, 8)
    Bp = _round_up(B, tile_b)
    nb = Bp // tile_b

    # --- pad + cast operands (bf16 into the MXU; biases stay f32) ----------
    xp = (
        jnp.zeros((Bp, D0p), operand_dtype)
        .at[:B, :D0]
        .set(xf.astype(operand_dtype))
    )
    wps, bps = [], []
    for l, (w, b) in enumerate(zip(weights, biases)):
        din, dout = dims_p[l], dims_p[l + 1]
        wps.append(
            jnp.zeros((din, dout), operand_dtype)
            .at[: w.shape[0], : w.shape[1]]
            .set(w.astype(operand_dtype))
        )
        bps.append(
            jnp.zeros((1, dout), jnp.float32)
            .at[0, : b.shape[0]]
            .set(b.astype(jnp.float32))
        )

    # --- specs --------------------------------------------------------------
    in_specs = [
        pl.BlockSpec((tile_b, tile_k), lambda i, k: (i, k)),          # x
        pl.BlockSpec((tile_k, dims_p[1]), lambda i, k: (k, 0)),        # W0 (K-sliced)
        pl.BlockSpec((1, dims_p[1]), lambda i, k: (0, 0)),             # b0
    ]
    for l in range(1, num_layers):
        in_specs.append(
            pl.BlockSpec((dims_p[l], dims_p[l + 1]), lambda i, k: (0, 0))
        )
        in_specs.append(pl.BlockSpec((1, dims_p[l + 1]), lambda i, k: (0, 0)))

    out_specs = pl.BlockSpec((tile_b, dims_p[-1]), lambda i, k: (i, 0))

    # --- VMEM budget (double-buffered inputs/outputs + scratch + headroom) --
    bpe = jnp.dtype(operand_dtype).itemsize
    est = 2 * tile_b * tile_k * bpe                      # x tile
    est += 2 * tile_k * dims_p[1] * bpe                  # W0 K-block
    est += 2 * dims_p[1] * 4                             # b0
    for l in range(1, num_layers):
        est += 2 * dims_p[l] * dims_p[l + 1] * bpe       # tail weights
        est += 2 * dims_p[l + 1] * 4                     # tail biases
    est += 2 * tile_b * dims_p[-1] * 4                   # out tile (f32)
    est += tile_b * dims_p[1] * 4                        # acc scratch
    vmem_limit = int(min(est + (8 << 20), 112 << 20))

    kernel = _make_decoder_kernel(num_layers, normalize)

    fn = pl.pallas_call(
        kernel,
        out_shape=jax.ShapeDtypeStruct((Bp, dims_p[-1]), jnp.float32),
        grid_spec=pltpu.PrefetchScalarGridSpec(
            num_scalar_prefetch=0,
            grid=(nb, nk),                      # reduction axis (K) last
            in_specs=in_specs,
            out_specs=out_specs,
            scratch_shapes=[pltpu.VMEM((tile_b, dims_p[1]), jnp.float32)],
        ),
        compiler_params=pltpu.CompilerParams(
            dimension_semantics=("parallel", "arbitrary"),
            vmem_limit_bytes=vmem_limit,
        ),
    )

    args = [xp]
    for w, b in zip(wps, bps):
        args += [w, b]
    out = fn(*args)
    return out[:B, : dims[-1]]


def init_decoder_params(key, layer_sizes):
    """Deterministic nn.Linear-style init (uniform +/- 1/sqrt(fan_in)).

    Returns weights as [in, out] (transposed relative to nn.Linear.weight).
    """
    weights, biases = [], []
    for fin, fout in zip(layer_sizes[:-1], layer_sizes[1:]):
        kw, kb, key = jax.random.split(key, 3)
        bound = 1.0 / jnp.sqrt(jnp.float32(fin))
        w = jax.random.uniform(kw, (fin, fout), jnp.float32, -bound, bound)
        b = jax.random.uniform(kb, (fout,), jnp.float32, -bound, bound)
        weights.append(w)
        biases.append(b)
    return weights, biases


def decoder_reference(x, weights, biases, *, normalize=False):
    """Pure-JAX f32 reference mirroring the PyTorch forward (eval mode)."""
    h = x.reshape(x.shape[0], -1).astype(jnp.float32)
    for layer, (w, b) in enumerate(zip(weights, biases)):
        if layer > 0:
            h = jnp.where(h >= 0.0, h, LEAKY_SLOPE * h)
        h = h @ w.astype(jnp.float32) + b.astype(jnp.float32)
    if normalize:
        h = h / jnp.linalg.norm(h, axis=1, keepdims=True)
    return h


if __name__ == "__main__":
    key = jax.random.PRNGKey(0)

    # Decoder(layer_sizes=[64, 48, 32], dropout_p=0.0, normalize=True)
    layer_sizes = [64, 48, 32]
    normalize = True

    kx, kp = jax.random.split(key)
    # fMRI-style input with trailing spatial dims: flatten(start_dim=1) -> 64 feats
    x = jax.random.normal(kx, (8, 4, 4, 4), dtype=jnp.float32)

    weights, biases = init_decoder_params(kp, layer_sizes)

    out = decoder_forward(x, weights, biases, normalize=normalize)
    out = jax.block_until_ready(out)

    ref = decoder_reference(x, weights, biases, normalize=normalize)
    assert out.shape == (8, layer_sizes[-1]), out.shape
    assert bool(jnp.all(jnp.isfinite(out)))
    # bf16 MXU operands vs f32 reference -> loose tolerance.
    max_err = float(jnp.max(jnp.abs(out - ref)))
    assert max_err < 3e-2, max_err

    print("KERNEL_OK")
</pallas_src>

<mosaic_0001>
module attributes {stable_mosaic.version = 11 : i64} {
  func.func @kernel(%arg0: i32, %arg1: i32, %arg2: memref<8x128xbf16, #tpu.memory_space<vmem>>, %arg3: memref<128x128xbf16, #tpu.memory_space<vmem>>, %arg4: memref<1x128xf32, #tpu.memory_space<vmem>>, %arg5: memref<128x128xbf16, #tpu.memory_space<vmem>>, %arg6: memref<1x128xf32, #tpu.memory_space<vmem>>, %arg7: memref<8x128xf32, #tpu.memory_space<vmem>>, %arg8: memref<8x128xf32, #tpu.memory_space<vmem>>) attributes {dimension_semantics = [#tpu.dimension_semantics<parallel>, #tpu.dimension_semantics<arbitrary>], iteration_bounds = array<i64: 1, 1>, scalar_prefetch = 0 : i64, scratch_operands = 1 : i64, tpu.core_type = #tpu.core_type<tc>, window_params = [{transform_indices = @transform_0, window_bounds = array<i64: 8, 128>}, {transform_indices = @transform_1, window_bounds = array<i64: 128, 128>}, {pipeline_mode = #tpu.pipeline_mode<synchronous>, transform_indices = @transform_2, window_bounds = array<i64: 1, 128>}, {pipeline_mode = #tpu.pipeline_mode<synchronous>, transform_indices = @transform_3, window_bounds = array<i64: 128, 128>}, {pipeline_mode = #tpu.pipeline_mode<synchronous>, transform_indices = @transform_4, window_bounds = array<i64: 1, 128>}, {transform_indices = @transform_5, window_bounds = array<i64: 8, 128>}]} {
    %c0_i32 = arith.constant 0 : i32
    %0 = arith.cmpi eq, %arg1, %c0_i32 : i32
    %1 = arith.extui %0 : i1 to i32
    %c0_i32_0 = arith.constant 0 : i32
    %2 = arith.cmpi ne, %1, %c0_i32_0 : i32
    scf.if %2 {
      %cst_10 = arith.constant 0.000000e+00 : f32
      %12 = vector.broadcast %cst_10 : f32 to vector<8x128xf32>
      %c0_11 = arith.constant 0 : index
      %c0_12 = arith.constant 0 : index
      %13 = vector.load %arg8[%c0_11, %c0_12] : memref<8x128xf32, #tpu.memory_space<vmem>>, vector<8x128xf32>
      tpu.vector_store %arg8[%c0_11, %c0_12], %12 {strides = array<i32>} : memref<8x128xf32, #tpu.memory_space<vmem>>, vector<8x128xf32>,
    } else {
    }
    %c0 = arith.constant 0 : index
    %c0_1 = arith.constant 0 : index
    %3 = vector.load %arg8[%c0, %c0_1] : memref<8x128xf32, #tpu.memory_space<vmem>>, vector<8x128xf32>
    %c0_2 = arith.constant 0 : index
    %c0_3 = arith.constant 0 : index
    %4 = vector.load %arg2[%c0_2, %c0_3] : memref<8x128xbf16, #tpu.memory_space<vmem>>, vector<8x128xbf16>
    %c0_4 = arith.constant 0 : index
    %c0_5 = arith.constant 0 : index
    %5 = vector.load %arg3[%c0_4, %c0_5] : memref<128x128xbf16, #tpu.memory_space<vmem>>, vector<128x128xbf16>
    %cst = arith.constant dense<0.000000e+00> : vector<8x128xf32>
    %6 = tpu.matmul %4, %5, %cst {dimension_numbers = #tpu.dot_dimension_numbers<[1], [0], [0], [1], [0, 0, 1, 1], [], []>} : vector<8x128xbf16>, vector<128x128xbf16>, vector<8x128xf32> -> vector<8x128xf32>
    %7 = arith.addf %3, %6 : vector<8x128xf32>
    %c0_6 = arith.constant 0 : index
    %c0_7 = arith.constant 0 : index
    %8 = vector.load %arg8[%c0_6, %c0_7] : memref<8x128xf32, #tpu.memory_space<vmem>>, vector<8x128xf32>
    tpu.vector_store %arg8[%c0_6, %c0_7], %7 {strides = array<i32>} : memref<8x128xf32, #tpu.memory_space<vmem>>, vector<8x128xf32>,
    %c0_i32_8 = arith.constant 0 : i32
    %9 = arith.cmpi eq, %arg1, %c0_i32_8 : i32
    %10 = arith.extui %9 : i1 to i32
    %c0_i32_9 = arith.constant 0 : i32
    %11 = arith.cmpi ne, %10, %c0_i32_9 : i32
    scf.if %11 {
      %c0_10 = arith.constant 0 : index
      %c0_11 = arith.constant 0 : index
      %12 = vector.load %arg8[%c0_10, %c0_11] : memref<8x128xf32, #tpu.memory_space<vmem>>, vector<8x128xf32>
      %c0_12 = arith.constant 0 : index
      %c0_13 = arith.constant 0 : index
      %13 = vector.load %arg4[%c0_12, %c0_13] : memref<1x128xf32, #tpu.memory_space<vmem>>, vector<1x128xf32>
      %14 = vector.broadcast %13 : vector<1x128xf32> to vector<8x128xf32>
      %15 = arith.addf %12, %14 : vector<8x128xf32>
      %cst_14 = arith.constant 0.000000e+00 : f32
      %16 = vector.broadcast %cst_14 : f32 to vector<8x128xf32>
      %17 = arith.cmpf oge, %15, %16 : vector<8x128xf32>
      %cst_15 = arith.constant 0.00999999977 : f32
      %18 = vector.broadcast %cst_15 : f32 to vector<8x128xf32>
      %19 = arith.mulf %18, %15 : vector<8x128xf32>
      %20 = arith.select %17, %15, %19 : vector<8x128xi1>, vector<8x128xf32>
      %21 = arith.truncf %20 : vector<8x128xf32> to vector<8x128xbf16>
      %c0_16 = arith.constant 0 : index
      %c0_17 = arith.constant 0 : index
      %22 = vector.load %arg5[%c0_16, %c0_17] : memref<128x128xbf16, #tpu.memory_space<vmem>>, vector<128x128xbf16>
      %cst_18 = arith.constant dense<0.000000e+00> : vector<8x128xf32>
      %23 = tpu.matmul %21, %22, %cst_18 {dimension_numbers = #tpu.dot_dimension_numbers<[1], [0], [0], [1], [0, 0, 1, 1], [], []>} : vector<8x128xbf16>, vector<128x128xbf16>, vector<8x128xf32> -> vector<8x128xf32>
      %c0_19 = arith.constant 0 : index
      %c0_20 = arith.constant 0 : index
      %24 = vector.load %arg6[%c0_19, %c0_20] : memref<1x128xf32, #tpu.memory_space<vmem>>, vector<1x128xf32>
      %25 = vector.broadcast %24 : vector<1x128xf32> to vector<8x128xf32>
      %26 = arith.addf %23, %25 : vector<8x128xf32>
      %27 = arith.mulf %26, %26 : vector<8x128xf32>
      %cst_21 = arith.constant dense<0.000000e+00> : vector<8xf32>
      %28 = vector.multi_reduction <add>, %27, %cst_21 [1] : vector<8x128xf32> to vector<8xf32>
      %29 = vector.shape_cast %28 : vector<8xf32> to vector<8x1xf32>
      %30 = math.rsqrt %29 : vector<8x1xf32>
      %31 = vector.broadcast %30 : vector<8x1xf32> to vector<8x128xf32>
      %32 = arith.mulf %26, %31 : vector<8x128xf32>
      %c0_22 = arith.constant 0 : index
      %c0_23 = arith.constant 0 : index
      %33 = vector.load %arg7[%c0_22, %c0_23] : memref<8x128xf32, #tpu.memory_space<vmem>>, vector<8x128xf32>
      tpu.vector_store %arg7[%c0_22, %c0_23], %32 {strides = array<i32>} : memref<8x128xf32, #tpu.memory_space<vmem>>, vector<8x128xf32>,
    } else {
    }
    return
  }
  func.func @transform_0(%arg0: i32, %arg1: i32) -> (i32, i32) {
    %c0_i32 = arith.constant 0 : i32
    return %arg0, %arg1 : i32, i32
  }
  func.func @transform_1(%arg0: i32, %arg1: i32) -> (i32, i32) {
    %c0_i32 = arith.constant 0 : i32
    %c0_i32_0 = arith.constant 0 : i32
    return %arg1, %c0_i32 : i32, i32
  }
  func.func @transform_2(%arg0: i32, %arg1: i32) -> (i32, i32) {
    %c0_i32 = arith.constant 0 : i32
    %c0_i32_0 = arith.constant 0 : i32
    %c0_i32_1 = arith.constant 0 : i32
    return %c0_i32, %c0_i32_0 : i32, i32
  }
  func.func @transform_3(%arg0: i32, %arg1: i32) -> (i32, i32) {
    %c0_i32 = arith.constant 0 : i32
    %c0_i32_0 = arith.constant 0 : i32
    %c0_i32_1 = arith.constant 0 : i32
    return %c0_i32, %c0_i32_0 : i32, i32
  }
  func.func @transform_4(%arg0: i32, %arg1: i32) -> (i32, i32) {
    %c0_i32 = arith.constant 0 : i32
    %c0_i32_0 = arith.constant 0 : i32
    %c0_i32_1 = arith.constant 0 : i32
    return %c0_i32, %c0_i32_0 : i32, i32
  }
  func.func @transform_5(%arg0: i32, %arg1: i32) -> (i32, i32) {
    %c0_i32 = arith.constant 0 : i32
    %c0_i32_0 = arith.constant 0 : i32
    return %arg0, %c0_i32 : i32, i32
  }
}

</mosaic_0001>

<bundles_post_ra>
// kernel: tpu_custom_call.1
= control target key start
LH: loop header
LB: loop body
LE: loop exit
PB: predicated region body
PF: predicated region fallthrough
CT: control target
= control target key end

     0   :  { %10 = vsyncpa [#allocation4], 0  ;;  %s617_s0 = inlined_call_operand.hbm [shape: bf16[8,128], index: 0, kind: input, shape index: {}]   ;;  %s618_s1 = inlined_call_operand.hbm [shape: bf16[128,128], index: 1, kind: input, shape index: {}]   ;;  %s619_s2 = inlined_call_operand.vmem [shape: f32[1,128], index: 2, kind: input, shape index: {}]   ;;  %s620_s3 = inlined_call_operand.hbm [shape: bf16[128,128], index: 3, kind: input, shape index: {}]   ;;  %s621_s4 = inlined_call_operand.vmem [shape: f32[1,128], index: 4, kind: input, shape index: {}]   ;;  %s622_s5 = inlined_call_operand.hbm [shape: f32[8,128], index: 5, kind: output, shape index: {}]  }
   0x1   :  { %11 = vsyncpa [#allocation7], 0 }
   0x2   :  { %12 = vsyncpa [#allocation5], 0  ;;  %s519_s18 = smov [#allocation6]   ;;  %s425_s22 = scalar_lea.hbm %s618_s1, 1024 }
   0x3   :  { %s28_s19 = sshll.u32 %s519_s18, 4  ;;  %p426_p0 = scmp.ne.s32.totalorder %s618_s1, %s425_s22  ;;  %s29_s19 = int_to_ptr.vmem [resolvable:$true] %s28_s19 }
   0x4   :  { %p429_p1 = scmp.lt.u32.totalorder %s425_s22, %s618_s1 }
   0x6   :  { %p431_p2 = pnand %p429_p1, %p426_p0 }
   0x8   :  { %434 = shalt.err (!%p431_p2)
}
   0x9   :  { %s435_s27 = scalar_lea.vmem %s29_s19, 1024  ;;  %p440_p4 = scmp.lt.s32.totalorder %s29_s19, %s29_s19 }
   0xa   :  { %p436_p3 = scmp.ne.s32.totalorder %s29_s19, %s435_s27  ;;  %p441_p5 = scmp.lt.s32.totalorder %s435_s27, %s435_s27 }
   0xc   :  { %p442_p6 = por %p441_p5, %p440_p4 }
   0xe   :  { %p443_p7 = pnand %p442_p6, %p436_p3 }
  0x10   :  { %446 = shalt.err (!%p443_p7)
}
  0x11   :  { %s520_s28 = smov 64   ;;  %s521_s29 = smov 4  }
  0x12   :  { %34 = dma.hbm_to_vmem [thread:$0]  %s618_s1, 1024, %s29_s19, [#allocation7], %s520_s28, %s520_s28, %s521_s29  }
  0x13   :  { %s522_s7 = smov [#allocation3]   ;;  %s523_s9 = smov [#allocation8]  }
  0x14   :  { %s19_s8 = sshll.u32 %s522_s7, 4  ;;  %s42_s10 = sshll.u32 %s523_s9, 4  ;;  %s20_s8 = int_to_ptr.vmem [resolvable:$true] %s19_s8  ;;  %s43_s10 = int_to_ptr.vmem [resolvable:$true] %s42_s10 }
  0x15   :  { %s447_s13 = scalar_lea.hbm %s617_s0, 64 }
  0x16   :  { %p448_p8 = scmp.ne.s32.totalorder %s617_s0, %s447_s13  ;;  %p451_p9 = scmp.lt.u32.totalorder %s447_s13, %s617_s0 }
  0x18   :  { %p453_p10 = pnand %p451_p9, %p448_p8 }
  0x1a   :  { %456 = shalt.err (!%p453_p10)
}
  0x1b   :  { %s457_s1 = scalar_lea.vmem %s20_s8, 64  ;;  %p462_p12 = scmp.lt.s32.totalorder %s20_s8, %s20_s8 }
  0x1c   :  { %p458_p11 = scmp.ne.s32.totalorder %s20_s8, %s457_s1  ;;  %p463_p13 = scmp.lt.s32.totalorder %s457_s1, %s457_s1 }
  0x1e   :  { %p464_p0 = por %p463_p13, %p462_p12 }
  0x20   :  { %p465_p1 = pnand %p464_p0, %p458_p11 }
  0x22   :  { %468 = shalt.err (!%p465_p1)
}
  0x23   :  { %22 = dma.hbm_to_vmem [thread:$0]  %s617_s0, 64, %s20_s8, [#allocation4]  }
  0x24   :  { %s469_s22 = scalar_lea.hbm %s620_s3, 1024 }
  0x25   :  { %p470_p2 = scmp.ne.s32.totalorder %s620_s3, %s469_s22  ;;  %p473_p3 = scmp.lt.u32.totalorder %s469_s22, %s620_s3 }
  0x27   :  { %p475_p4 = pnand %p473_p3, %p470_p2 }
  0x29   :  { %478 = shalt.err (!%p475_p4)
}
  0x2a   :  { %s479_s27 = scalar_lea.vmem %s43_s10, 1024  ;;  %p484_p6 = scmp.lt.s32.totalorder %s43_s10, %s43_s10 }
  0x2b   :  { %p480_p5 = scmp.ne.s32.totalorder %s43_s10, %s479_s27  ;;  %p485_p7 = scmp.lt.s32.totalorder %s479_s27, %s479_s27 }
  0x2d   :  { %p486_p8 = por %p485_p7, %p484_p6 }
  0x2f   :  { %p487_p9 = pnand %p486_p8, %p480_p5 }
  0x31   :  { %490 = shalt.err (!%p487_p9)
}
  0x32   :  { %48 = dma.hbm_to_vmem [thread:$0]  %s620_s3, 1024, %s43_s10, [#allocation7], %s520_s28, %s520_s28, %s521_s29  }
  0x33   :  { %513 = dma.done.wait [#allocation4], 64  }
  0x34   :  { %514 = vsyncadd [#allocation4], 4294967232 }
  0x35   :  { %515 = dma.done.wait [#allocation7], 2048  }
  0x36   :  { %516 = vsyncadd [#allocation7], 4294965248  ;;  %v524_v0 = vmov 0.0   ;;  %vm525_vm0 = vmmov 0   ;;  %v407_v1 = vld [vmem:[#allocation6] sm:$0xff]   ;;  %v408_v2 = vld [vmem:[#allocation6 + $0x8] sm:$0xff]  }
  0x37   :  { %359 = vmatprep.subr.bf16.mxu0 %v524_v0  ;;  %375 = vmatprep.mubr.msk.bf16.mxu0 %vm525_vm0, %v524_v0  ;;  %v409_v3 = vld [vmem:[#allocation6 + $0x10] sm:$0xff]   ;;  %v415_v4 = vld [vmem:[#allocation8] sm:$0xff]   ;;  %v410_v5 = vld [vmem:[#allocation6 + $0x18] sm:$0xff]  }
  0x38   :  { %379 = vmatprep.subr.bf16.mxu1 %v524_v0  ;;  %395 = vmatprep.mubr.msk.bf16.mxu1 %vm525_vm0, %v524_v0  ;;  %v416_v6 = vld [vmem:[#allocation8 + $0x8] sm:$0xff]   ;;  %v411_v7 = vld [vmem:[#allocation6 + $0x20] sm:$0xff]   ;;  %v417_v8 = vld [vmem:[#allocation8 + $0x10] sm:$0xff]  }
  0x39   :  { %360 = vmatpush3.bf16.msra.mxu0 %v407_v1  ;;  %380 = vmatpush3.bf16.msra.mxu1 %v415_v4  ;;  %v412_v9 = vld [vmem:[#allocation6 + $0x28] sm:$0xff]   ;;  %v418_v10 = vld [vmem:[#allocation8 + $0x18] sm:$0xff]   ;;  %v413_v11 = vld [vmem:[#allocation6 + $0x30] sm:$0xff]  }
  0x3a   :  { %361 = vmatprep.subr.bf16.mxu0 %v524_v0  ;;  %381 = vmatprep.subr.bf16.mxu1 %v524_v0  ;;  %v419_v12 = vld [vmem:[#allocation8 + $0x20] sm:$0xff]   ;;  %v414_v13 = vld [vmem:[#allocation6 + $0x38] sm:$0xff]   ;;  %v420_v14 = vld [vmem:[#allocation8 + $0x28] sm:$0xff]  }
  0x3b   :  { %v67_v15 = vld [vmem:[#allocation3] sm:$0xf]  ;;  %v421_v16 = vld [vmem:[#allocation8 + $0x30] sm:$0xff]  }
  0x3c   :  { %v422_v17 = vld [vmem:[#allocation8 + $0x38] sm:$0xff]  }
  0x3d   :  { %362 = vmatpush3.bf16.msra.mxu0 %v408_v2  ;;  %382 = vmatpush3.bf16.msra.mxu1 %v416_v6  ;;  %v331_v18 = vld [vmem:[%s619_s2] ss:$0 sm:$0xff]  ;;  %s526_s2 = smov [#allocation9]  }
  0x3e   :  { %363 = vmatprep.subr.bf16.mxu0 %v524_v0  ;;  %383 = vmatprep.subr.bf16.mxu1 %v524_v0  ;;  %v332_v27 = vld [vmem:[%s621_s4] ss:$0 sm:$0xff]  ;;  %s313_s7 = sshll.u32 %s526_s2, 4  ;;  %s314_s7 = int_to_ptr.vmem [resolvable:$true] %s313_s7 }
  0x3f   :  { %s491_s8 = scalar_lea.vmem %s314_s7, 128  ;;  %p496_p11 = scmp.lt.s32.totalorder %s314_s7, %s314_s7 }
  0x40   :  { %p492_p10 = scmp.ne.s32.totalorder %s314_s7, %s491_s8  ;;  %p497_p12 = scmp.lt.s32.totalorder %s491_s8, %s491_s8 }
  0x41   :  { %364 = vmatpush3.bf16.msra.mxu0 %v409_v3  ;;  %384 = vmatpush3.bf16.msra.mxu1 %v417_v8 }
  0x42   :  { %365 = vmatprep.subr.bf16.mxu0 %v524_v0  ;;  %385 = vmatprep.subr.bf16.mxu1 %v524_v0  ;;  %p498_p13 = por %p497_p12, %p496_p11 }
  0x44   :  { %p499_p0 = pnand %p498_p13, %p492_p10 }
  0x45   :  { %366 = vmatpush3.bf16.msra.mxu0 %v410_v5  ;;  %386 = vmatpush3.bf16.msra.mxu1 %v418_v10 }
  0x46   :  { %367 = vmatprep.subr.bf16.mxu0 %v524_v0  ;;  %387 = vmatprep.subr.bf16.mxu1 %v524_v0 }
  0x49   :  { %368 = vmatpush3.bf16.msra.mxu0 %v411_v7  ;;  %388 = vmatpush3.bf16.msra.mxu1 %v419_v12 }
  0x4a   :  { %369 = vmatprep.subr.bf16.mxu0 %v524_v0  ;;  %389 = vmatprep.subr.bf16.mxu1 %v524_v0 }
  0x4d   :  { %370 = vmatpush3.bf16.msra.mxu0 %v412_v9  ;;  %390 = vmatpush3.bf16.msra.mxu1 %v420_v14 }
  0x4e   :  { %371 = vmatprep.subr.bf16.mxu0 %v524_v0  ;;  %391 = vmatprep.subr.bf16.mxu1 %v524_v0 }
  0x51   :  { %372 = vmatpush3.bf16.msra.mxu0 %v413_v11  ;;  %392 = vmatpush3.bf16.msra.mxu1 %v421_v16 }
  0x52   :  { %373 = vmatprep.subr.bf16.mxu0 %v524_v0  ;;  %393 = vmatprep.subr.bf16.mxu1 %v524_v0 }
  0x55   :  { %374 = vmatpush3.bf16.msra.mxu0 %v414_v13  ;;  %394 = vmatpush3.bf16.msra.mxu1 %v422_v17 }
  0x58   :  { %376 = vmatmul.mubr.bf16.vlgmr.msra.gmra.mrb[0].mxu0 %v67_v15 }
 0x12b   :  { %v166_v19 = vpop.f32.mrb[0].mxu0 }
 0x12c   :  { %v185_v20 = vadd.f32 %v331_v18, %v166_v19  ;;  %v377_v21 = vpop.f32.mrb[1].mxu0 }
 0x12d   :  { %v169_v22 = vpop.f32.mrb[2].mxu0 }
 0x12e   :  { %vm186_vm1 = vcmp.ge.f32.partialorder %v185_v20, 0.0  ;;  %v187_v23 = vmul.f32 0.01, %v185_v20  ;;  %v378_v24 = vpop.f32.mrb[3].mxu0 }
 0x130   :  { %v188_v25 = vsel %vm186_vm1, %v185_v20, %v187_v23 }
 0x131   :  { %v189_v26 = vpack.c.bf16 %v188_v25, %v188_v25 }
 0x133   :  { %396 = vmatmul.mubr.bf16.vlgmr.msra.gmra.mrb[0].mxu1 %v189_v26 }
 0x206   :  { %v295_v28 = vpop.f32.mrb[0].mxu1 }
 0x207   :  { %v296_v29 = vadd.f32 %v332_v27, %v295_v28  ;;  %v397_v30 = vpop.f32.mrb[1].mxu1 }
 0x208   :  { %v298_v31 = vpop.f32.mrb[2].mxu1 }
 0x209   :  { %v398_v32 = vpop.f32.mrb[3].mxu1  ;;  %v301_v33 = vmul.f32 %v296_v29, %v296_v29 }
 0x20b   :  { %302 = vadd.xlane.f32.xlu0 %v301_v33 }
 0x298   :  { %v303_v34 = vpop.xlane.xlu0 %302 }
 0x299   :  { %423 = vrsqrt.f32 %v303_v34 }
 0x2a3   :  { %v424_v35 = vpop.eup %423 }
 0x2a4   :  { %v305_v36 = vmul.f32 %v424_v35, %v296_v29 }
 0x2a6   :  { %306 = vst [vmem:[#allocation9] sm:$0xff] %v305_v36 }
 0x2a7   :  { %502 = shalt.err (!%p499_p0)
}
 0x2a8   :  { %s503_s10 = scalar_lea.hbm %s622_s5, 128 }
 0x2a9   :  { %p504_p1 = scmp.ne.s32.totalorder %s622_s5, %s503_s10  ;;  %p507_p2 = scmp.lt.u32.totalorder %s503_s10, %s622_s5 }
 0x2ab   :  { %p509_p3 = pnand %p507_p2, %p504_p1 }
 0x2ad   :  { %512 = shalt.err (!%p509_p3)
}
 0x2ae   :  { %316 = dma.vmem_to_hbm [thread:$0]  %s314_s7, 128, %s622_s5, [#allocation5]  }
 0x2af   :  { %517 = dma.done.wait [#allocation5], 128  }
 0x2b0   :  { %518 = vsyncadd [#allocation5], 4294967168 }
 0x2b1   :  { %320 = vsyncpa [#allocation4], 1 }
 0x2b2   :  { %321 = vsyncpa [#allocation7], 1 }
 0x2b3   :  { %322 = vsyncpa [#allocation5], 1 }

</bundles_post_ra>
